<compile_context>
chip_gen: v5e
topology: v5e:2x2
jax: 0.10.0
libtpu: 0.0.40
codegen_flags: <defaults>
</compile_context>

<pallas_src>
import jax
import jax.numpy as jnp
from jax.experimental import pallas as pl
from jax.experimental.pallas import tpu as pltpu


def _round_up(x, m):
    return ((x + m - 1) // m) * m


# ---------------------------------------------------------------------------
# Kernels
# ---------------------------------------------------------------------------
def _ffn_kernel_resident(x_ref, w1_ref, b1_ref, w2_ref, b2_ref, o_ref):
    # Single d_ff step: weight/bias block indices are constant over the grid,
    # so W1/W2/b1/b2 are DMA'd once and stay resident in VMEM while row tiles
    # of x stream through.  No accumulator scratch needed.
    h = jnp.dot(x_ref[...], w1_ref[...], preferred_element_type=jnp.float32)
    h = jnp.maximum(h + b1_ref[...].astype(jnp.float32), 0.0)
    # Dropout: eval mode -> identity.
    acc = jnp.dot(h.astype(w2_ref.dtype), w2_ref[...],
                  preferred_element_type=jnp.float32)
    o_ref[...] = (acc + b2_ref[...].astype(jnp.float32)).astype(o_ref.dtype)


def _ffn_kernel_tiled(x_ref, w1_ref, b1_ref, w2_ref, b2_ref, o_ref, acc_ref):
    # d_ff tiled as a reduction-style grid axis k.  Each step computes
    # h_k = relu(x @ W1[:, k] + b1[k]) exactly (the first matmul's contraction
    # dim, d_model, is not tiled) and accumulates h_k @ W2[k, :] in f32.
    k = pl.program_id(1)

    @pl.when(k == 0)
    def _():
        acc_ref[...] = jnp.zeros_like(acc_ref)

    h = jnp.dot(x_ref[...], w1_ref[...], preferred_element_type=jnp.float32)
    h = jnp.maximum(h + b1_ref[...].astype(jnp.float32), 0.0)
    # Dropout: eval mode -> identity.
    acc_ref[...] += jnp.dot(h.astype(w2_ref.dtype), w2_ref[...],
                            preferred_element_type=jnp.float32)

    @pl.when(k == pl.num_programs(1) - 1)
    def _():
        o_ref[...] = (acc_ref[...]
                      + b2_ref[...].astype(jnp.float32)).astype(o_ref.dtype)


# ---------------------------------------------------------------------------
# Tile / VMEM budgeting
# ---------------------------------------------------------------------------
def _vmem_budget_bytes():
    phys = 64 * 1024 * 1024  # conservative default (v7x per-TensorCore VMEM)
    try:
        info = pltpu.get_tpu_info()
        cap = getattr(info, "vmem_capacity_bytes", None)
        if cap:
            phys = int(cap)
    except Exception:
        pass
    # Leave headroom for Mosaic internal scratch / semaphores / spills:
    # ~102 MiB on 128 MiB chips (v5e/v6e), ~48 MiB on 64 MiB chips (v7x).
    return max(32 * 1024 * 1024,
               min(int(phys * 0.8), phys - 16 * 1024 * 1024))


def _vmem_estimate(tm, tf, d_model, itemsize, single_k):
    # Double-buffered pipeline blocks (Pallas default) + kernel intermediates.
    x_blk = 2 * tm * d_model * itemsize
    o_blk = 2 * tm * d_model * itemsize
    w1_blk = 2 * d_model * tf * itemsize
    w2_blk = 2 * tf * d_model * itemsize
    b_blk = 2 * 8 * (tf + d_model) * itemsize          # sublane-padded biases
    h_tmp = tm * tf * 4 + tm * tf * itemsize           # f32 h + cast copy
    acc = 0 if single_k else tm * d_model * 4
    return x_blk + o_blk + w1_blk + w2_blk + b_blk + h_tmp + acc


def _select_tiles(n_rows, d_model, d_ff, itemsize, budget, tm_req, tf_req):
    rows8 = _round_up(max(n_rows, 1), 8)
    tm_eff = min(tm_req, rows8)
    if n_rows >= 512:
        # Guarantee >= 2 row tiles so the 'parallel' axis shards across v7x's
        # two TensorCores (harmless on single-TC v5e/v6e).
        tm_eff = min(tm_eff, max(256, ((n_rows // 2) // 256) * 256))
    if tm_eff < rows8:
        tm_eff = (tm_eff // 256) * 256 if tm_eff >= 256 else max(8, (tm_eff // 8) * 8)
    else:
        tm_eff = rows8

    if tf_req is not None:
        # Explicit d_ff tile requested (128-granular), honored as given.
        tf_eff = min(max(128, (min(tf_req, d_ff) // 128) * 128), d_ff)
    else:
        # Prefer full weight residency (single k step) whenever it fits VMEM.
        if _vmem_estimate(tm_eff, d_ff, d_model, itemsize, True) <= budget:
            tf_eff = d_ff
        else:
            # 256-aligned slabs; shrink tf first, then tm, until it fits.
            tf_eff = min(max(256, ((d_ff // 2) // 256) * 256), d_ff)
            while (tf_eff > 256 and
                   _vmem_estimate(tm_eff, tf_eff, d_model, itemsize,
                                  tf_eff >= d_ff) > budget):
                tf_eff -= 256
            while (tm_eff > 256 and
                   _vmem_estimate(tm_eff, tf_eff, d_model, itemsize,
                                  tf_eff >= d_ff) > budget):
                tm_eff = max(256, tm_eff - 256)
    return tm_eff, tf_eff


# ---------------------------------------------------------------------------
# Wrappers
# ---------------------------------------------------------------------------
def positionwise_feed_forward_t(x, w1_t, b1, w2_t, b2, *, tm=512, tf=None):
    """FFN with pre-transposed ((in, out)-layout) weights.

    x: (B, S, d_model); w1_t: (d_model, d_ff); b1: (d_ff,);
    w2_t: (d_ff, d_model); b2: (d_model,).
    tf=None -> auto: keep full W1/W2 resident in VMEM when they fit (single
    d_ff step); otherwise tile d_ff in 256-aligned slabs.
    For best MXU rate / half the HBM traffic, pass bf16 inputs & weights
    (accumulation stays f32 inside the kernel).
    """
    B, S, d_model = x.shape
    d_ff = w1_t.shape[1]
    dtype = x.dtype
    itemsize = jnp.dtype(dtype).itemsize
    n_rows = B * S

    budget = _vmem_budget_bytes()
    tm_eff, tf_eff = _select_tiles(n_rows, d_model, d_ff, itemsize, budget,
                                   tm, tf)

    rows_p = _round_up(n_rows, tm_eff)
    x2d = x.reshape(n_rows, d_model)
    if rows_p != n_rows:
        x2d = jnp.pad(x2d, ((0, rows_p - n_rows), (0, 0)))

    b1_2d = b1.reshape(1, d_ff)
    b2_2d = b2.reshape(1, d_model)

    single_k = tf_eff >= d_ff
    if single_k:
        dff_p = d_ff
    else:
        dff_p = _round_up(d_ff, tf_eff)
        if dff_p != d_ff:
            # Exact: relu(0 + 0) = 0 and padded W2 rows are zero.
            # TODO(synk): pre-pad at parameter-init time to avoid per-call pad.
            w1_t = jnp.pad(w1_t, ((0, 0), (0, dff_p - d_ff)))
            b1_2d = jnp.pad(b1_2d, ((0, 0), (0, dff_p - d_ff)))
            w2_t = jnp.pad(w2_t, ((0, dff_p - d_ff), (0, 0)))

    grid0 = rows_p // tm_eff
    flops = 4 * n_rows * d_model * d_ff
    # Honest HBM estimate: weights re-streamed per row tile only when tiled.
    w_reads = (1 if single_k else grid0) * (w1_t.size + w2_t.size)
    bytes_accessed = int((x2d.size + rows_p * d_model + w_reads
                          + b1_2d.size + b2_2d.size) * itemsize)
    cost = pl.CostEstimate(flops=flops, transcendentals=0,
                           bytes_accessed=bytes_accessed)

    if single_k:
        out2d = pl.pallas_call(
            _ffn_kernel_resident,
            out_shape=jax.ShapeDtypeStruct((rows_p, d_model), dtype),
            grid_spec=pltpu.PrefetchScalarGridSpec(
                num_scalar_prefetch=0,
                grid=(grid0,),
                in_specs=[
                    pl.BlockSpec((tm_eff, d_model), lambda i: (i, 0)),  # x rows
                    pl.BlockSpec((d_model, d_ff), lambda i: (0, 0)),    # W1 resident
                    pl.BlockSpec((1, d_ff), lambda i: (0, 0)),          # b1 resident
                    pl.BlockSpec((d_ff, d_model), lambda i: (0, 0)),    # W2 resident
                    pl.BlockSpec((1, d_model), lambda i: (0, 0)),       # b2 resident
                ],
                out_specs=pl.BlockSpec((tm_eff, d_model), lambda i: (i, 0)),
            ),
            compiler_params=pltpu.CompilerParams(
                dimension_semantics=("parallel",),
                vmem_limit_bytes=budget,
            ),
            cost_estimate=cost,
        )(x2d, w1_t, b1_2d, w2_t, b2_2d)
    else:
        grid = (grid0, dff_p // tf_eff)
        out2d = pl.pallas_call(
            _ffn_kernel_tiled,
            out_shape=jax.ShapeDtypeStruct((rows_p, d_model), dtype),
            grid_spec=pltpu.PrefetchScalarGridSpec(
                num_scalar_prefetch=0,
                grid=grid,
                in_specs=[
                    pl.BlockSpec((tm_eff, d_model), lambda i, k: (i, 0)),  # x rows
                    pl.BlockSpec((d_model, tf_eff), lambda i, k: (0, k)),  # W1 slab
                    pl.BlockSpec((1, tf_eff), lambda i, k: (0, k)),        # b1 slab
                    pl.BlockSpec((tf_eff, d_model), lambda i, k: (k, 0)),  # W2 slab
                    pl.BlockSpec((1, d_model), lambda i, k: (0, 0)),       # b2
                ],
                out_specs=pl.BlockSpec((tm_eff, d_model), lambda i, k: (i, 0)),
                scratch_shapes=[pltpu.VMEM((tm_eff, d_model), jnp.float32)],
            ),
            compiler_params=pltpu.CompilerParams(
                dimension_semantics=("parallel", "arbitrary"),
                vmem_limit_bytes=budget,
            ),
            cost_estimate=cost,
        )(x2d, w1_t, b1_2d, w2_t, b2_2d)

    if rows_p != n_rows:
        out2d = out2d[:n_rows]
    return out2d.reshape(B, S, d_model)


def positionwise_feed_forward(x, w1, b1, w2, b2, *, tm=512, tf=None):
    """Compatibility wrapper for PyTorch nn.Linear-layout weights:
       w1: (d_ff, d_model), w2: (d_model, d_ff).
    For production, pre-transpose the weights ONCE at parameter-init time and
    call positionwise_feed_forward_t directly (avoids per-call HBM transpose)."""
    return positionwise_feed_forward_t(x, jnp.transpose(w1), b1,
                                       jnp.transpose(w2), b2, tm=tm, tf=tf)


def _reference(x, w1, b1, w2, b2):
    # Pure-JAX reference (eval-mode dropout == identity), PyTorch layout.
    return jnp.maximum(x @ w1.T + b1, 0.0) @ w2.T + b2


if __name__ == "__main__":
    key = jax.random.PRNGKey(0)

    def make_params(key, d_model, d_ff, dtype):
        kw1, kb1, kw2, kb2, key = jax.random.split(key, 5)
        w1 = (jax.random.normal(kw1, (d_ff, d_model), jnp.float32) * 0.05).astype(dtype)
        b1 = (jax.random.normal(kb1, (d_ff,), jnp.float32) * 0.05).astype(dtype)
        w2 = (jax.random.normal(kw2, (d_model, d_ff), jnp.float32) * 0.05).astype(dtype)
        b2 = (jax.random.normal(kb2, (d_model,), jnp.float32) * 0.05).astype(dtype)
        return (w1, b1, w2, b2), key

    # Case 1: small shapes matching the module forward, f32, auto tiles,
    # PyTorch-layout compatibility wrapper (weight-resident single-k path).
    B, S, d_model, d_ff = 2, 8, 32, 64
    kx, key = jax.random.split(key)
    x = jax.random.normal(kx, (B, S, d_model), dtype=jnp.float32)
    (w1, b1, w2, b2), key = make_params(key, d_model, d_ff, jnp.float32)
    out = jax.block_until_ready(positionwise_feed_forward(x, w1, b1, w2, b2))
    ref = _reference(x, w1, b1, w2, b2)
    assert out.shape == (B, S, d_model)
    assert jnp.allclose(out, ref, atol=1e-4, rtol=1e-4), "case 1 mismatch"

    # Case 2: ragged row count (row padding) + forced d_ff tiling with
    # d_ff padding (384 -> 512), pre-transposed API, multi-k accumulator path.
    B, S, d_model, d_ff = 3, 5, 128, 384
    kx, key = jax.random.split(key)
    x = jax.random.normal(kx, (B, S, d_model), dtype=jnp.float32)
    (w1, b1, w2, b2), key = make_params(key, d_model, d_ff, jnp.float32)
    w1_t, w2_t = jnp.transpose(w1), jnp.transpose(w2)   # pre-transposed once
    out = jax.block_until_ready(
        positionwise_feed_forward_t(x, w1_t, b1, w2_t, b2, tm=8, tf=256))
    ref = _reference(x, w1, b1, w2, b2)
    assert out.shape == (B, S, d_model)
    assert jnp.allclose(out, ref, atol=1e-4, rtol=1e-4), "case 2 mismatch"

    # Case 3: bf16 end-to-end (native-dtype MXU feed, f32 accumulation),
    # weight-resident path, pre-transposed API.
    B, S, d_model, d_ff = 2, 32, 128, 256
    kx, key = jax.random.split(key)
    x = jax.random.normal(kx, (B, S, d_model), dtype=jnp.float32).astype(jnp.bfloat16)
    (w1, b1, w2, b2), key = make_params(key, d_model, d_ff, jnp.bfloat16)
    w1_t, w2_t = jnp.transpose(w1), jnp.transpose(w2)
    out = jax.block_until_ready(
        positionwise_feed_forward_t(x, w1_t, b1, w2_t, b2))
    ref = _reference(x.astype(jnp.float32), w1.astype(jnp.float32),
                     b1.astype(jnp.float32), w2.astype(jnp.float32),
                     b2.astype(jnp.float32))
    assert out.shape == (B, S, d_model)
    assert jnp.allclose(out.astype(jnp.float32), ref, atol=2e-2, rtol=2e-2), \
        "case 3 mismatch"

    print("KERNEL_OK")
</pallas_src>

<mosaic_0001>
module attributes {stable_mosaic.version = 11 : i64} {
  func.func @_ffn_kernel_resident(%arg0: i32, %arg1: memref<16x32xf32, #tpu.memory_space<vmem>>, %arg2: memref<32x64xf32, #tpu.memory_space<vmem>>, %arg3: memref<1x64xf32, #tpu.memory_space<vmem>>, %arg4: memref<64x32xf32, #tpu.memory_space<vmem>>, %arg5: memref<1x32xf32, #tpu.memory_space<vmem>>, %arg6: memref<16x32xf32, #tpu.memory_space<vmem>>) attributes {dimension_semantics = [#tpu.dimension_semantics<parallel>], iteration_bounds = array<i64: 1>, scalar_prefetch = 0 : i64, scratch_operands = 0 : i64, tpu.core_type = #tpu.core_type<tc>, window_params = [{transform_indices = @transform_0, window_bounds = array<i64: 16, 32>}, {pipeline_mode = #tpu.pipeline_mode<synchronous>, transform_indices = @transform_1, window_bounds = array<i64: 32, 64>}, {pipeline_mode = #tpu.pipeline_mode<synchronous>, transform_indices = @transform_2, window_bounds = array<i64: 1, 64>}, {pipeline_mode = #tpu.pipeline_mode<synchronous>, transform_indices = @transform_3, window_bounds = array<i64: 64, 32>}, {pipeline_mode = #tpu.pipeline_mode<synchronous>, transform_indices = @transform_4, window_bounds = array<i64: 1, 32>}, {transform_indices = @transform_5, window_bounds = array<i64: 16, 32>}]} {
    %c0 = arith.constant 0 : index
    %c0_0 = arith.constant 0 : index
    %0 = vector.load %arg1[%c0, %c0_0] : memref<16x32xf32, #tpu.memory_space<vmem>>, vector<16x32xf32>
    %c0_1 = arith.constant 0 : index
    %c0_2 = arith.constant 0 : index
    %1 = vector.load %arg2[%c0_1, %c0_2] : memref<32x64xf32, #tpu.memory_space<vmem>>, vector<32x64xf32>
    %cst = arith.constant dense<0.000000e+00> : vector<16x64xf32>
    %2 = tpu.matmul %0, %1, %cst {dimension_numbers = #tpu.dot_dimension_numbers<[1], [0], [0], [1], [0, 0, 1, 1], [], []>} : vector<16x32xf32>, vector<32x64xf32>, vector<16x64xf32> -> vector<16x64xf32>
    %c0_3 = arith.constant 0 : index
    %c0_4 = arith.constant 0 : index
    %3 = vector.load %arg3[%c0_3, %c0_4] : memref<1x64xf32, #tpu.memory_space<vmem>>, vector<1x64xf32>
    %4 = vector.broadcast %3 : vector<1x64xf32> to vector<16x64xf32>
    %5 = arith.addf %2, %4 : vector<16x64xf32>
    %cst_5 = arith.constant 0.000000e+00 : f32
    %6 = vector.broadcast %cst_5 : f32 to vector<16x64xf32>
    %7 = arith.maximumf %5, %6 : vector<16x64xf32>
    %c0_6 = arith.constant 0 : index
    %c0_7 = arith.constant 0 : index
    %8 = vector.load %arg4[%c0_6, %c0_7] : memref<64x32xf32, #tpu.memory_space<vmem>>, vector<64x32xf32>
    %cst_8 = arith.constant dense<0.000000e+00> : vector<16x32xf32>
    %9 = tpu.matmul %7, %8, %cst_8 {dimension_numbers = #tpu.dot_dimension_numbers<[1], [0], [0], [1], [0, 0, 1, 1], [], []>} : vector<16x64xf32>, vector<64x32xf32>, vector<16x32xf32> -> vector<16x32xf32>
    %c0_9 = arith.constant 0 : index
    %c0_10 = arith.constant 0 : index
    %10 = vector.load %arg5[%c0_9, %c0_10] : memref<1x32xf32, #tpu.memory_space<vmem>>, vector<1x32xf32>
    %11 = vector.broadcast %10 : vector<1x32xf32> to vector<16x32xf32>
    %12 = arith.addf %9, %11 : vector<16x32xf32>
    %c0_11 = arith.constant 0 : index
    %c0_12 = arith.constant 0 : index
    %13 = vector.load %arg6[%c0_11, %c0_12] : memref<16x32xf32, #tpu.memory_space<vmem>>, vector<16x32xf32>
    tpu.vector_store %arg6[%c0_11, %c0_12], %12 {strides = array<i32>} : memref<16x32xf32, #tpu.memory_space<vmem>>, vector<16x32xf32>,
    return
  }
  func.func @transform_0(%arg0: i32) -> (i32, i32) {
    %c0_i32 = arith.constant 0 : i32
    %c0_i32_0 = arith.constant 0 : i32
    return %arg0, %c0_i32 : i32, i32
  }
  func.func @transform_1(%arg0: i32) -> (i32, i32) {
    %c0_i32 = arith.constant 0 : i32
    %c0_i32_0 = arith.constant 0 : i32
    %c0_i32_1 = arith.constant 0 : i32
    return %c0_i32, %c0_i32_0 : i32, i32
  }
  func.func @transform_2(%arg0: i32) -> (i32, i32) {
    %c0_i32 = arith.constant 0 : i32
    %c0_i32_0 = arith.constant 0 : i32
    %c0_i32_1 = arith.constant 0 : i32
    return %c0_i32, %c0_i32_0 : i32, i32
  }
  func.func @transform_3(%arg0: i32) -> (i32, i32) {
    %c0_i32 = arith.constant 0 : i32
    %c0_i32_0 = arith.constant 0 : i32
    %c0_i32_1 = arith.constant 0 : i32
    return %c0_i32, %c0_i32_0 : i32, i32
  }
  func.func @transform_4(%arg0: i32) -> (i32, i32) {
    %c0_i32 = arith.constant 0 : i32
    %c0_i32_0 = arith.constant 0 : i32
    %c0_i32_1 = arith.constant 0 : i32
    return %c0_i32, %c0_i32_0 : i32, i32
  }
  func.func @transform_5(%arg0: i32) -> (i32, i32) {
    %c0_i32 = arith.constant 0 : i32
    %c0_i32_0 = arith.constant 0 : i32
    return %arg0, %c0_i32 : i32, i32
  }
}

</mosaic_0001>

<bundles_post_ra>
// kernel: tpu_custom_call.1
= control target key start
LH: loop header
LB: loop body
LE: loop exit
PB: predicated region body
PF: predicated region fallthrough
CT: control target
= control target key end

     0   :  { %s260_s0 = inlined_call_operand.vmem [shape: f32[16,32], index: 0, kind: input, shape index: {}]   ;;  %s261_s1 = inlined_call_operand.vmem [shape: f32[32,64], index: 1, kind: input, shape index: {}]   ;;  %s262_s2 = inlined_call_operand.vmem [shape: f32[1,64], index: 2, kind: input, shape index: {}]   ;;  %s263_s3 = inlined_call_operand.vmem [shape: f32[64,32], index: 3, kind: input, shape index: {}]   ;;  %s264_s4 = inlined_call_operand.vmem [shape: f32[1,32], index: 4, kind: input, shape index: {}]   ;;  %s265_s5 = inlined_call_operand.hbm [shape: f32[16,32], index: 5, kind: output, shape index: {}]  }
   0x1   :  { %v26_v0 = vld [vmem:[%s261_s1 + $0x18] sm:$0xff]  ;;  %v25_v1 = vld [vmem:[%s261_s1 + $0x10] sm:$0xff]  ;;  %v24_v2 = vld [vmem:[%s261_s1 + $0x8] sm:$0xff] }
   0x2   :  { %129 = vmatpush.msra.mxu3 %v26_v0  ;;  %50 = vmatpush.msra.mxu0 %v26_v0  ;;  %v70_v3 = vld [vmem:[%s263_s3 + $0x38] sm:$0xff]  ;;  %v69_v4 = vld [vmem:[%s263_s3 + $0x30] sm:$0xff]  ;;  %v23_v5 = vld [vmem:[%s261_s1] sm:$0xff] }
   0x3   :  { %133 = vmatpush.msra.mxu2 %v70_v3  ;;  %90 = vmatpush.msra.mxu1 %v70_v3 }
   0x4   :  { %130 = vmatpush.msra.mxu3 %v25_v1  ;;  %51 = vmatpush.msra.mxu0 %v25_v1 }
   0x5   :  { %10 = vsyncpa [#allocation3], 0  ;;  %v22_v6 = vld [vmem:[%s260_s0 + $0x8] sm:$0xff]  ;;  %vm31_vm0 = vcmask 261120   ;;  %v21_v7 = vld [vmem:[%s260_s0] sm:$0xff]  ;;  %134 = vmatpush.msra.mxu2 %v69_v4  ;;  %91 = vmatpush.msra.mxu1 %v69_v4  ;;  %vm75_vm1 = vcmask 523264  }
   0x6   :  { %131 = vmatpush.msra.mxu3 %v24_v2  ;;  %52 = vmatpush.msra.mxu0 %v24_v2  ;;  %v68_v8 = vld [vmem:[%s263_s3 + $0x28] sm:$0xff]  ;;  %v67_v9 = vld [vmem:[%s263_s3 + $0x20] sm:$0xff]  ;;  %v66_v10 = vld [vmem:[%s263_s3 + $0x18] sm:$0xff]  ;;  %s113_s25 = sshll.u32 %s265_s5, 4  ;;  %s173_s26 = smov 128   ;;  %s114_s25 = int_to_ptr.hbm [resolvable:$true] %s113_s25 }
   0x7   :  { %135 = vmatpush.msra.mxu2 %v68_v8  ;;  %92 = vmatpush.msra.mxu1 %v68_v8  ;;  %v65_v11 = vld [vmem:[%s263_s3 + $0x10] sm:$0xff]  ;;  %v64_v12 = vld [vmem:[%s263_s3 + $0x8] sm:$0xff]  ;;  %v63_v13 = vld [vmem:[%s263_s3] sm:$0xff]  ;;  %s172_s3 = smov [#allocation2]   ;;  %s174_s27 = smov 8  }
   0x8   :  { %132 = vmatpush.msra.mxu3 %v23_v5  ;;  %53 = vmatpush.msra.mxu0 %v23_v5  ;;  %v144_v14 = vld [vmem:[%s262_s2] ss:$0 sm:$0xff]  ;;  %s111_s23 = sshll.u32 %s172_s3, 4  ;;  %s112_s23 = int_to_ptr.vmem [resolvable:$true] %s111_s23 }
   0x9   :  { %126 = vmatmul.msk.f32.vlgmr.msra.gmra.mxu3 %vm31_vm0, %v22_v6  ;;  %125 = vmatmul.msk.f32.vlgmr.msra.gmra.mxu0 %vm31_vm0, %v21_v7  ;;  %v145_v21 = vld [vmem:[%s264_s4] ss:$0 sm:$0xff] }
   0xa   :  { %136 = vmatpush.msra.mxu2 %v67_v9  ;;  %93 = vmatpush.msra.mxu1 %v67_v9 }
   0xc   :  { %137 = vmatpush.msra.mxu2 %v66_v10  ;;  %94 = vmatpush.msra.mxu1 %v66_v10 }
   0xe   :  { %138 = vmatpush.msra.mxu2 %v65_v11  ;;  %95 = vmatpush.msra.mxu1 %v65_v11 }
  0x10   :  { %139 = vmatpush.msra.mxu2 %v64_v12  ;;  %96 = vmatpush.msra.mxu1 %v64_v12 }
  0x12   :  { %140 = vmatpush.msra.mxu2 %v63_v13  ;;  %97 = vmatpush.msra.mxu1 %v63_v13 }
  0x86   :  { %v55_v15 = vpop.f32.mrf.mxu0 }
  0x87   :  { %v56_v16 = vadd.f32 %v144_v14, %v55_v15 }
  0x89   :  { %v61_v17 = vmax.f32 %v56_v16, 0.0 }
  0x8b   :  { %127 = vmatmul.msk.f32.vlgmr.msra.gmra.mxu1 %vm75_vm1, %v61_v17 }
  0x8c   :  { %v58_v18 = vpop.f32.mrf.mxu3 }
  0x8d   :  { %v59_v19 = vadd.f32 %v144_v14, %v58_v18 }
  0x8f   :  { %v62_v20 = vmax.f32 %v59_v19, 0.0 }
  0x91   :  { %128 = vmatmul.msk.f32.vlgmr.msra.gmra.mxu2 %vm75_vm1, %v62_v20 }
 0x108   :  { %v99_v22 = vpop.f32.mrf.mxu1 }
 0x109   :  { %v100_v23 = vadd.f32 %v145_v21, %v99_v22 }
 0x10b   :  { %105 = vst.msk [vmem:[#allocation2] sm:$0xff] %vm31_vm0, %v100_v23 }
 0x114   :  { %v102_v24 = vpop.f32.mrf.mxu2 }
 0x115   :  { %v103_v25 = vadd.f32 %v145_v21, %v102_v24 }
 0x117   :  { %106 = vst.msk [vmem:[#allocation2 + $0x8] sm:$0xff] %vm31_vm0, %v103_v25 }
 0x118   :  { %119 = dma.vmem_to_hbm [thread:$0]  %s112_s23, 256, %s114_s25, [#allocation3], %s173_s26, %s173_s26, %s174_s27  }
 0x119   :  { %170 = dma.done.wait [#allocation3], 256  }
 0x11a   :  { %171 = vsyncadd [#allocation3], 4294967040 }
 0x11b   :  { %124 = vsyncpa [#allocation3], 1 }

</bundles_post_ra>
